<compile_context>
chip_gen: v5e
topology: v5e:2x2
jax: 0.10.0
libtpu: 0.0.40
codegen_flags: <defaults>
</compile_context>

<pallas_src>
import functools

import jax
import jax.numpy as jnp
from jax.experimental import pallas as pl
from jax.experimental.pallas import tpu as pltpu


def lstm_classifier_kernel(x_ref, wih_ref, whh_ref, b_ref, wout_ref, bout_ref,
                           out_ref, gx_ref, *, seq_len, batch, hidden_dim):
    """x_ref:   (T*B, E)    bf16  (batch already padded to a multiple of 8)
       wih_ref: (E, 4H)     bf16  PyTorch (i, f, g, o) order, g-columns x2
       whh_ref: (H, 4H)     bf16  PyTorch (i, f, g, o) order, g-columns x2
       b_ref:   (1, 4H)     f32   fused b_ih + b_hh, g-part x2
       wout_ref:(H, Cpad)   bf16  zero-padded beyond C
       bout_ref:(1, Cpad)   f32   -1e30 in padded lanes
       out_ref: (B, Cpad)   f32   log-probs (padded lanes are garbage)
       gx_ref:  (T*B, 4H)   f32   VMEM scratch for the hoisted projection."""
    T, B, H = seq_len, batch, hidden_dim

    whh = whh_ref[...]                      # (H, 4H) bf16, loop-invariant

    # --- Hoisted input projection: one wide MXU matmul, result parked in
    # VMEM scratch so it never bloats vreg live ranges across the unroll. ---
    gx_ref[...] = jnp.dot(x_ref[...], wih_ref[...],
                          preferred_element_type=jnp.float32) + b_ref[...]

    h = jnp.zeros((B, H), jnp.float32)
    c = jnp.zeros((B, H), jnp.float32)

    # --- Recurrence: fully unrolled (T is static and small). ---------------
    for t in range(T):
        gates = gx_ref[t * B:(t + 1) * B, :] + jnp.dot(
            h.astype(jnp.bfloat16), whh,
            preferred_element_type=jnp.float32)          # (B, 4H) f32
        # One whole-vreg sigmoid; g was pre-scaled by 2 at prep time, so
        # tanh(z) == 2*sigmoid(2z) - 1 (cheap VPU fixup that co-issues).
        sig = jax.nn.sigmoid(gates)                      # (B, 4H)
        i_g = sig[:, 0 * H:1 * H]
        f_g = sig[:, 1 * H:2 * H]
        g_g = 2.0 * sig[:, 2 * H:3 * H] - 1.0
        o_g = sig[:, 3 * H:4 * H]
        c = f_g * c + i_g * g_g
        h = o_g * jnp.tanh(c)

    # --- hidden2tag + LogSoftmax (lane-dense padded output). ----------------
    logits = jnp.dot(h.astype(jnp.bfloat16), wout_ref[...],
                     preferred_element_type=jnp.float32) + bout_ref[...]
    m = jnp.max(logits, axis=1, keepdims=True)
    z = logits - m
    lse = jnp.log(jnp.sum(jnp.exp(z), axis=1, keepdims=True))
    out_ref[...] = z - lse


def lstm_classifier_forward(x, w_ih, w_hh, b_ih, b_hh, w_out, b_out):
    """x: (T, B, E) float32 (seq-major, PyTorch non-batch_first convention).
       Weights follow PyTorch shapes: w_ih (4H, E), w_hh (4H, H),
       b_ih/b_hh (4H,), w_out (C, H), b_out (C,).
       Returns (B, C) log-probabilities."""
    T, B, E = x.shape
    four_h = w_ih.shape[0]
    H = four_h // 4
    C = w_out.shape[0]

    B_pad = max(8, ((B + 7) // 8) * 8)          # sublane granularity
    C_pad = max(128, ((C + 127) // 128) * 128)  # lane-dense output

    # --- Parameter prep (glue): transpose, scale the g-gate columns by 2
    # (tanh(z) = 2*sigmoid(2z) - 1 -> single sigmoid pass in the kernel),
    # fuse LSTM biases, pad output projection, cast matmul weights to bf16.
    # Scaling by 2 is exact in bf16 (exponent bump), so no precision loss. ---
    g_scale = jnp.ones((four_h,), jnp.float32).at[2 * H:3 * H].set(2.0)

    wih_t = (jnp.transpose(w_ih).astype(jnp.float32) * g_scale
             ).astype(jnp.bfloat16)                                   # (E, 4H)
    whh_t = (jnp.transpose(w_hh).astype(jnp.float32) * g_scale
             ).astype(jnp.bfloat16)                                   # (H, 4H)
    b = ((b_ih + b_hh).astype(jnp.float32) * g_scale).reshape(1, four_h)

    wout_t = jnp.transpose(w_out).astype(jnp.bfloat16)                # (H, C)
    wout_p = jnp.zeros((H, C_pad), jnp.bfloat16).at[:, :C].set(wout_t)
    bout_p = jnp.full((1, C_pad), -1e30, jnp.float32).at[0, :C].set(
        b_out.astype(jnp.float32))

    # Pad batch (zero rows; they evolve through the bias-driven recurrence but
    # stay bounded and are sliced away) and flatten (T, B_pad) -> (T*B_pad).
    x_p = jnp.zeros((T, B_pad, E), jnp.bfloat16).at[:, :B, :].set(
        x.astype(jnp.bfloat16))
    x2d = x_p.reshape(T * B_pad, E)

    kernel = functools.partial(lstm_classifier_kernel,
                               seq_len=T, batch=B_pad, hidden_dim=H)
    vmem = pl.BlockSpec(memory_space=pltpu.MemorySpace.VMEM)

    out_p = pl.pallas_call(
        kernel,
        out_shape=jax.ShapeDtypeStruct((B_pad, C_pad), jnp.float32),
        in_specs=[vmem] * 6,
        out_specs=vmem,
        scratch_shapes=[pltpu.VMEM((T * B_pad, four_h), jnp.float32)],
    )(x2d, wih_t, whh_t, b, wout_p, bout_p)

    # Padded output lanes hold ~-1e30 garbage; always slice to [:B, :C].
    return out_p[:B, :C]


def _reference_forward(x, w_ih, w_hh, b_ih, b_hh, w_out, b_out):
    """Pure-JAX f32 reference mirroring PyTorch nn.LSTM + Linear + LogSoftmax."""
    T, B, E = x.shape
    H = w_hh.shape[1]
    h = jnp.zeros((B, H), jnp.float32)
    c = jnp.zeros((B, H), jnp.float32)
    for t in range(T):
        gates = x[t] @ w_ih.T + b_ih + h @ w_hh.T + b_hh
        i_g = jax.nn.sigmoid(gates[:, 0 * H:1 * H])
        f_g = jax.nn.sigmoid(gates[:, 1 * H:2 * H])
        g_g = jnp.tanh(gates[:, 2 * H:3 * H])
        o_g = jax.nn.sigmoid(gates[:, 3 * H:4 * H])
        c = f_g * c + i_g * g_g
        h = o_g * jnp.tanh(c)
    logits = h @ w_out.T + b_out
    return jax.nn.log_softmax(logits, axis=1)


if __name__ == "__main__":
    # Small shapes consistent with the module's forward.
    seq_len, batch = 8, 2
    embedding_dim, hidden_dim, tagset_size = 16, 32, 8

    key = jax.random.PRNGKey(0)
    ks = jax.random.split(key, 7)
    scale = 1.0 / jnp.sqrt(hidden_dim)

    x = jax.random.normal(ks[0], (seq_len, batch, embedding_dim), jnp.float32)
    w_ih = jax.random.uniform(ks[1], (4 * hidden_dim, embedding_dim),
                              jnp.float32, -scale, scale)
    w_hh = jax.random.uniform(ks[2], (4 * hidden_dim, hidden_dim),
                              jnp.float32, -scale, scale)
    b_ih = jax.random.uniform(ks[3], (4 * hidden_dim,), jnp.float32, -scale, scale)
    b_hh = jax.random.uniform(ks[4], (4 * hidden_dim,), jnp.float32, -scale, scale)
    w_out = jax.random.uniform(ks[5], (tagset_size, hidden_dim),
                               jnp.float32, -scale, scale)
    b_out = jax.random.uniform(ks[6], (tagset_size,), jnp.float32, -scale, scale)

    out = lstm_classifier_forward(x, w_ih, w_hh, b_ih, b_hh, w_out, b_out)
    out = jax.block_until_ready(out)

    ref = _reference_forward(x, w_ih, w_hh, b_ih, b_hh, w_out, b_out)
    assert out.shape == (batch, tagset_size)
    assert jnp.all(jnp.isfinite(out)), "non-finite output"
    # bf16 matmul weights (f32 accumulation) vs. a pure-f32 reference: this
    # tolerance is validated at T=8; bf16 drift through the recurrence grows
    # with T, so re-gate the tolerance if T increases substantially.
    assert jnp.allclose(out, ref, atol=2e-2, rtol=2e-2), "mismatch vs reference"

    print("KERNEL_OK")
</pallas_src>

<mosaic_0001>
module attributes {stable_mosaic.version = 11 : i64} {
  func.func @lstm_classifier_kernel(%arg0: memref<64x16xbf16, #tpu.memory_space<vmem>>, %arg1: memref<16x128xbf16, #tpu.memory_space<vmem>>, %arg2: memref<32x128xbf16, #tpu.memory_space<vmem>>, %arg3: memref<1x128xf32, #tpu.memory_space<vmem>>, %arg4: memref<32x128xbf16, #tpu.memory_space<vmem>>, %arg5: memref<1x128xf32, #tpu.memory_space<vmem>>, %arg6: memref<8x128xf32, #tpu.memory_space<vmem>>, %arg7: memref<64x128xf32, #tpu.memory_space<vmem>>) attributes {dimension_semantics = [], scalar_prefetch = 0 : i64, scratch_operands = 1 : i64, tpu.core_type = #tpu.core_type<tc>} {
    %c0 = arith.constant 0 : index
    %c0_0 = arith.constant 0 : index
    %0 = vector.load %arg2[%c0, %c0_0] : memref<32x128xbf16, #tpu.memory_space<vmem>>, vector<32x128xbf16>
    %c0_1 = arith.constant 0 : index
    %c0_2 = arith.constant 0 : index
    %1 = vector.load %arg0[%c0_1, %c0_2] : memref<64x16xbf16, #tpu.memory_space<vmem>>, vector<64x16xbf16>
    %c0_3 = arith.constant 0 : index
    %c0_4 = arith.constant 0 : index
    %2 = vector.load %arg1[%c0_3, %c0_4] : memref<16x128xbf16, #tpu.memory_space<vmem>>, vector<16x128xbf16>
    %cst = arith.constant dense<0.000000e+00> : vector<64x128xf32>
    %3 = tpu.matmul %1, %2, %cst {dimension_numbers = #tpu.dot_dimension_numbers<[1], [0], [0], [1], [0, 0, 1, 1], [], []>} : vector<64x16xbf16>, vector<16x128xbf16>, vector<64x128xf32> -> vector<64x128xf32>
    %c0_5 = arith.constant 0 : index
    %c0_6 = arith.constant 0 : index
    %4 = vector.load %arg3[%c0_5, %c0_6] : memref<1x128xf32, #tpu.memory_space<vmem>>, vector<1x128xf32>
    %5 = vector.broadcast %4 : vector<1x128xf32> to vector<64x128xf32>
    %6 = arith.addf %3, %5 : vector<64x128xf32>
    %c0_7 = arith.constant 0 : index
    %c0_8 = arith.constant 0 : index
    %7 = vector.load %arg7[%c0_7, %c0_8] : memref<64x128xf32, #tpu.memory_space<vmem>>, vector<64x128xf32>
    tpu.vector_store %arg7[%c0_7, %c0_8], %6 {strides = array<i32>} : memref<64x128xf32, #tpu.memory_space<vmem>>, vector<64x128xf32>,
    %cst_9 = arith.constant 0.000000e+00 : f32
    %8 = vector.broadcast %cst_9 : f32 to vector<8x32xf32>
    %cst_10 = arith.constant 0.000000e+00 : f32
    %9 = vector.broadcast %cst_10 : f32 to vector<8x32xf32>
    %c0_11 = arith.constant 0 : index
    %c0_12 = arith.constant 0 : index
    %10 = vector.load %arg7[%c0_11, %c0_12] : memref<64x128xf32, #tpu.memory_space<vmem>>, vector<8x128xf32>
    %11 = arith.truncf %8 : vector<8x32xf32> to vector<8x32xbf16>
    %cst_13 = arith.constant dense<0.000000e+00> : vector<8x128xf32>
    %12 = tpu.matmul %11, %0, %cst_13 {dimension_numbers = #tpu.dot_dimension_numbers<[1], [0], [0], [1], [0, 0, 1, 1], [], []>} : vector<8x32xbf16>, vector<32x128xbf16>, vector<8x128xf32> -> vector<8x128xf32>
    %13 = arith.addf %10, %12 : vector<8x128xf32>
    %14 = arith.negf %13 : vector<8x128xf32>
    %15 = math.exp %14 : vector<8x128xf32>
    %cst_14 = arith.constant 1.000000e+00 : f32
    %16 = vector.broadcast %cst_14 : f32 to vector<8x128xf32>
    %17 = arith.addf %16, %15 : vector<8x128xf32>
    %18 = arith.divf %16, %17 : vector<8x128xf32>
    %19 = vector.extract_strided_slice %18 {offsets = [0, 0], sizes = [8, 32], strides = [1, 1]} : vector<8x128xf32> to vector<8x32xf32>
    %20 = vector.extract_strided_slice %18 {offsets = [0, 32], sizes = [8, 32], strides = [1, 1]} : vector<8x128xf32> to vector<8x32xf32>
    %21 = vector.extract_strided_slice %18 {offsets = [0, 64], sizes = [8, 32], strides = [1, 1]} : vector<8x128xf32> to vector<8x32xf32>
    %cst_15 = arith.constant 2.000000e+00 : f32
    %22 = vector.broadcast %cst_15 : f32 to vector<8x32xf32>
    %23 = arith.mulf %22, %21 : vector<8x32xf32>
    %cst_16 = arith.constant 1.000000e+00 : f32
    %24 = vector.broadcast %cst_16 : f32 to vector<8x32xf32>
    %25 = arith.subf %23, %24 : vector<8x32xf32>
    %26 = vector.extract_strided_slice %18 {offsets = [0, 96], sizes = [8, 32], strides = [1, 1]} : vector<8x128xf32> to vector<8x32xf32>
    %27 = arith.mulf %20, %9 : vector<8x32xf32>
    %28 = arith.mulf %19, %25 : vector<8x32xf32>
    %29 = arith.addf %27, %28 : vector<8x32xf32>
    %30 = math.tanh %29 : vector<8x32xf32>
    %31 = arith.mulf %26, %30 : vector<8x32xf32>
    %c8 = arith.constant 8 : index
    %c0_17 = arith.constant 0 : index
    %32 = vector.load %arg7[%c8, %c0_17] : memref<64x128xf32, #tpu.memory_space<vmem>>, vector<8x128xf32>
    %33 = arith.truncf %31 : vector<8x32xf32> to vector<8x32xbf16>
    %cst_18 = arith.constant dense<0.000000e+00> : vector<8x128xf32>
    %34 = tpu.matmul %33, %0, %cst_18 {dimension_numbers = #tpu.dot_dimension_numbers<[1], [0], [0], [1], [0, 0, 1, 1], [], []>} : vector<8x32xbf16>, vector<32x128xbf16>, vector<8x128xf32> -> vector<8x128xf32>
    %35 = arith.addf %32, %34 : vector<8x128xf32>
    %36 = arith.negf %35 : vector<8x128xf32>
    %37 = math.exp %36 : vector<8x128xf32>
    %cst_19 = arith.constant 1.000000e+00 : f32
    %38 = vector.broadcast %cst_19 : f32 to vector<8x128xf32>
    %39 = arith.addf %38, %37 : vector<8x128xf32>
    %40 = arith.divf %38, %39 : vector<8x128xf32>
    %41 = vector.extract_strided_slice %40 {offsets = [0, 0], sizes = [8, 32], strides = [1, 1]} : vector<8x128xf32> to vector<8x32xf32>
    %42 = vector.extract_strided_slice %40 {offsets = [0, 32], sizes = [8, 32], strides = [1, 1]} : vector<8x128xf32> to vector<8x32xf32>
    %43 = vector.extract_strided_slice %40 {offsets = [0, 64], sizes = [8, 32], strides = [1, 1]} : vector<8x128xf32> to vector<8x32xf32>
    %cst_20 = arith.constant 2.000000e+00 : f32
    %44 = vector.broadcast %cst_20 : f32 to vector<8x32xf32>
    %45 = arith.mulf %44, %43 : vector<8x32xf32>
    %cst_21 = arith.constant 1.000000e+00 : f32
    %46 = vector.broadcast %cst_21 : f32 to vector<8x32xf32>
    %47 = arith.subf %45, %46 : vector<8x32xf32>
    %48 = vector.extract_strided_slice %40 {offsets = [0, 96], sizes = [8, 32], strides = [1, 1]} : vector<8x128xf32> to vector<8x32xf32>
    %49 = arith.mulf %42, %29 : vector<8x32xf32>
    %50 = arith.mulf %41, %47 : vector<8x32xf32>
    %51 = arith.addf %49, %50 : vector<8x32xf32>
    %52 = math.tanh %51 : vector<8x32xf32>
    %53 = arith.mulf %48, %52 : vector<8x32xf32>
    %c16 = arith.constant 16 : index
    %c0_22 = arith.constant 0 : index
    %54 = vector.load %arg7[%c16, %c0_22] : memref<64x128xf32, #tpu.memory_space<vmem>>, vector<8x128xf32>
    %55 = arith.truncf %53 : vector<8x32xf32> to vector<8x32xbf16>
    %cst_23 = arith.constant dense<0.000000e+00> : vector<8x128xf32>
    %56 = tpu.matmul %55, %0, %cst_23 {dimension_numbers = #tpu.dot_dimension_numbers<[1], [0], [0], [1], [0, 0, 1, 1], [], []>} : vector<8x32xbf16>, vector<32x128xbf16>, vector<8x128xf32> -> vector<8x128xf32>
    %57 = arith.addf %54, %56 : vector<8x128xf32>
    %58 = arith.negf %57 : vector<8x128xf32>
    %59 = math.exp %58 : vector<8x128xf32>
    %cst_24 = arith.constant 1.000000e+00 : f32
    %60 = vector.broadcast %cst_24 : f32 to vector<8x128xf32>
    %61 = arith.addf %60, %59 : vector<8x128xf32>
    %62 = arith.divf %60, %61 : vector<8x128xf32>
    %63 = vector.extract_strided_slice %62 {offsets = [0, 0], sizes = [8, 32], strides = [1, 1]} : vector<8x128xf32> to vector<8x32xf32>
    %64 = vector.extract_strided_slice %62 {offsets = [0, 32], sizes = [8, 32], strides = [1, 1]} : vector<8x128xf32> to vector<8x32xf32>
    %65 = vector.extract_strided_slice %62 {offsets = [0, 64], sizes = [8, 32], strides = [1, 1]} : vector<8x128xf32> to vector<8x32xf32>
    %cst_25 = arith.constant 2.000000e+00 : f32
    %66 = vector.broadcast %cst_25 : f32 to vector<8x32xf32>
    %67 = arith.mulf %66, %65 : vector<8x32xf32>
    %cst_26 = arith.constant 1.000000e+00 : f32
    %68 = vector.broadcast %cst_26 : f32 to vector<8x32xf32>
    %69 = arith.subf %67, %68 : vector<8x32xf32>
    %70 = vector.extract_strided_slice %62 {offsets = [0, 96], sizes = [8, 32], strides = [1, 1]} : vector<8x128xf32> to vector<8x32xf32>
    %71 = arith.mulf %64, %51 : vector<8x32xf32>
    %72 = arith.mulf %63, %69 : vector<8x32xf32>
    %73 = arith.addf %71, %72 : vector<8x32xf32>
    %74 = math.tanh %73 : vector<8x32xf32>
    %75 = arith.mulf %70, %74 : vector<8x32xf32>
    %c24 = arith.constant 24 : index
    %c0_27 = arith.constant 0 : index
    %76 = vector.load %arg7[%c24, %c0_27] : memref<64x128xf32, #tpu.memory_space<vmem>>, vector<8x128xf32>
    %77 = arith.truncf %75 : vector<8x32xf32> to vector<8x32xbf16>
    %cst_28 = arith.constant dense<0.000000e+00> : vector<8x128xf32>
    %78 = tpu.matmul %77, %0, %cst_28 {dimension_numbers = #tpu.dot_dimension_numbers<[1], [0], [0], [1], [0, 0, 1, 1], [], []>} : vector<8x32xbf16>, vector<32x128xbf16>, vector<8x128xf32> -> vector<8x128xf32>
    %79 = arith.addf %76, %78 : vector<8x128xf32>
    %80 = arith.negf %79 : vector<8x128xf32>
    %81 = math.exp %80 : vector<8x128xf32>
    %cst_29 = arith.constant 1.000000e+00 : f32
    %82 = vector.broadcast %cst_29 : f32 to vector<8x128xf32>
    %83 = arith.addf %82, %81 : vector<8x128xf32>
    %84 = arith.divf %82, %83 : vector<8x128xf32>
    %85 = vector.extract_strided_slice %84 {offsets = [0, 0], sizes = [8, 32], strides = [1, 1]} : vector<8x128xf32> to vector<8x32xf32>
    %86 = vector.extract_strided_slice %84 {offsets = [0, 32], sizes = [8, 32], strides = [1, 1]} : vector<8x128xf32> to vector<8x32xf32>
    %87 = vector.extract_strided_slice %84 {offsets = [0, 64], sizes = [8, 32], strides = [1, 1]} : vector<8x128xf32> to vector<8x32xf32>
    %cst_30 = arith.constant 2.000000e+00 : f32
    %88 = vector.broadcast %cst_30 : f32 to vector<8x32xf32>
    %89 = arith.mulf %88, %87 : vector<8x32xf32>
    %cst_31 = arith.constant 1.000000e+00 : f32
    %90 = vector.broadcast %cst_31 : f32 to vector<8x32xf32>
    %91 = arith.subf %89, %90 : vector<8x32xf32>
    %92 = vector.extract_strided_slice %84 {offsets = [0, 96], sizes = [8, 32], strides = [1, 1]} : vector<8x128xf32> to vector<8x32xf32>
    %93 = arith.mulf %86, %73 : vector<8x32xf32>
    %94 = arith.mulf %85, %91 : vector<8x32xf32>
    %95 = arith.addf %93, %94 : vector<8x32xf32>
    %96 = math.tanh %95 : vector<8x32xf32>
    %97 = arith.mulf %92, %96 : vector<8x32xf32>
    %c32 = arith.constant 32 : index
    %c0_32 = arith.constant 0 : index
    %98 = vector.load %arg7[%c32, %c0_32] : memref<64x128xf32, #tpu.memory_space<vmem>>, vector<8x128xf32>
    %99 = arith.truncf %97 : vector<8x32xf32> to vector<8x32xbf16>
    %cst_33 = arith.constant dense<0.000000e+00> : vector<8x128xf32>
    %100 = tpu.matmul %99, %0, %cst_33 {dimension_numbers = #tpu.dot_dimension_numbers<[1], [0], [0], [1], [0, 0, 1, 1], [], []>} : vector<8x32xbf16>, vector<32x128xbf16>, vector<8x128xf32> -> vector<8x128xf32>
    %101 = arith.addf %98, %100 : vector<8x128xf32>
    %102 = arith.negf %101 : vector<8x128xf32>
    %103 = math.exp %102 : vector<8x128xf32>
    %cst_34 = arith.constant 1.000000e+00 : f32
    %104 = vector.broadcast %cst_34 : f32 to vector<8x128xf32>
    %105 = arith.addf %104, %103 : vector<8x128xf32>
    %106 = arith.divf %104, %105 : vector<8x128xf32>
    %107 = vector.extract_strided_slice %106 {offsets = [0, 0], sizes = [8, 32], strides = [1, 1]} : vector<8x128xf32> to vector<8x32xf32>
    %108 = vector.extract_strided_slice %106 {offsets = [0, 32], sizes = [8, 32], strides = [1, 1]} : vector<8x128xf32> to vector<8x32xf32>
    %109 = vector.extract_strided_slice %106 {offsets = [0, 64], sizes = [8, 32], strides = [1, 1]} : vector<8x128xf32> to vector<8x32xf32>
    %cst_35 = arith.constant 2.000000e+00 : f32
    %110 = vector.broadcast %cst_35 : f32 to vector<8x32xf32>
    %111 = arith.mulf %110, %109 : vector<8x32xf32>
    %cst_36 = arith.constant 1.000000e+00 : f32
    %112 = vector.broadcast %cst_36 : f32 to vector<8x32xf32>
    %113 = arith.subf %111, %112 : vector<8x32xf32>
    %114 = vector.extract_strided_slice %106 {offsets = [0, 96], sizes = [8, 32], strides = [1, 1]} : vector<8x128xf32> to vector<8x32xf32>
    %115 = arith.mulf %108, %95 : vector<8x32xf32>
    %116 = arith.mulf %107, %113 : vector<8x32xf32>
    %117 = arith.addf %115, %116 : vector<8x32xf32>
    %118 = math.tanh %117 : vector<8x32xf32>
    %119 = arith.mulf %114, %118 : vector<8x32xf32>
    %c40 = arith.constant 40 : index
    %c0_37 = arith.constant 0 : index
    %120 = vector.load %arg7[%c40, %c0_37] : memref<64x128xf32, #tpu.memory_space<vmem>>, vector<8x128xf32>
    %121 = arith.truncf %119 : vector<8x32xf32> to vector<8x32xbf16>
    %cst_38 = arith.constant dense<0.000000e+00> : vector<8x128xf32>
    %122 = tpu.matmul %121, %0, %cst_38 {dimension_numbers = #tpu.dot_dimension_numbers<[1], [0], [0], [1], [0, 0, 1, 1], [], []>} : vector<8x32xbf16>, vector<32x128xbf16>, vector<8x128xf32> -> vector<8x128xf32>
    %123 = arith.addf %120, %122 : vector<8x128xf32>
    %124 = arith.negf %123 : vector<8x128xf32>
    %125 = math.exp %124 : vector<8x128xf32>
    %cst_39 = arith.constant 1.000000e+00 : f32
    %126 = vector.broadcast %cst_39 : f32 to vector<8x128xf32>
    %127 = arith.addf %126, %125 : vector<8x128xf32>
    %128 = arith.divf %126, %127 : vector<8x128xf32>
    %129 = vector.extract_strided_slice %128 {offsets = [0, 0], sizes = [8, 32], strides = [1, 1]} : vector<8x128xf32> to vector<8x32xf32>
    %130 = vector.extract_strided_slice %128 {offsets = [0, 32], sizes = [8, 32], strides = [1, 1]} : vector<8x128xf32> to vector<8x32xf32>
    %131 = vector.extract_strided_slice %128 {offsets = [0, 64], sizes = [8, 32], strides = [1, 1]} : vector<8x128xf32> to vector<8x32xf32>
    %cst_40 = arith.constant 2.000000e+00 : f32
    %132 = vector.broadcast %cst_40 : f32 to vector<8x32xf32>
    %133 = arith.mulf %132, %131 : vector<8x32xf32>
    %cst_41 = arith.constant 1.000000e+00 : f32
    %134 = vector.broadcast %cst_41 : f32 to vector<8x32xf32>
    %135 = arith.subf %133, %134 : vector<8x32xf32>
    %136 = vector.extract_strided_slice %128 {offsets = [0, 96], sizes = [8, 32], strides = [1, 1]} : vector<8x128xf32> to vector<8x32xf32>
    %137 = arith.mulf %130, %117 : vector<8x32xf32>
    %138 = arith.mulf %129, %135 : vector<8x32xf32>
    %139 = arith.addf %137, %138 : vector<8x32xf32>
    %140 = math.tanh %139 : vector<8x32xf32>
    %141 = arith.mulf %136, %140 : vector<8x32xf32>
    %c48 = arith.constant 48 : index
    %c0_42 = arith.constant 0 : index
    %142 = vector.load %arg7[%c48, %c0_42] : memref<64x128xf32, #tpu.memory_space<vmem>>, vector<8x128xf32>
    %143 = arith.truncf %141 : vector<8x32xf32> to vector<8x32xbf16>
    %cst_43 = arith.constant dense<0.000000e+00> : vector<8x128xf32>
    %144 = tpu.matmul %143, %0, %cst_43 {dimension_numbers = #tpu.dot_dimension_numbers<[1], [0], [0], [1], [0, 0, 1, 1], [], []>} : vector<8x32xbf16>, vector<32x128xbf16>, vector<8x128xf32> -> vector<8x128xf32>
    %145 = arith.addf %142, %144 : vector<8x128xf32>
    %146 = arith.negf %145 : vector<8x128xf32>
    %147 = math.exp %146 : vector<8x128xf32>
    %cst_44 = arith.constant 1.000000e+00 : f32
    %148 = vector.broadcast %cst_44 : f32 to vector<8x128xf32>
    %149 = arith.addf %148, %147 : vector<8x128xf32>
    %150 = arith.divf %148, %149 : vector<8x128xf32>
    %151 = vector.extract_strided_slice %150 {offsets = [0, 0], sizes = [8, 32], strides = [1, 1]} : vector<8x128xf32> to vector<8x32xf32>
    %152 = vector.extract_strided_slice %150 {offsets = [0, 32], sizes = [8, 32], strides = [1, 1]} : vector<8x128xf32> to vector<8x32xf32>
    %153 = vector.extract_strided_slice %150 {offsets = [0, 64], sizes = [8, 32], strides = [1, 1]} : vector<8x128xf32> to vector<8x32xf32>
    %cst_45 = arith.constant 2.000000e+00 : f32
    %154 = vector.broadcast %cst_45 : f32 to vector<8x32xf32>
    %155 = arith.mulf %154, %153 : vector<8x32xf32>
    %cst_46 = arith.constant 1.000000e+00 : f32
    %156 = vector.broadcast %cst_46 : f32 to vector<8x32xf32>
    %157 = arith.subf %155, %156 : vector<8x32xf32>
    %158 = vector.extract_strided_slice %150 {offsets = [0, 96], sizes = [8, 32], strides = [1, 1]} : vector<8x128xf32> to vector<8x32xf32>
    %159 = arith.mulf %152, %139 : vector<8x32xf32>
    %160 = arith.mulf %151, %157 : vector<8x32xf32>
    %161 = arith.addf %159, %160 : vector<8x32xf32>
    %162 = math.tanh %161 : vector<8x32xf32>
    %163 = arith.mulf %158, %162 : vector<8x32xf32>
    %c56 = arith.constant 56 : index
    %c0_47 = arith.constant 0 : index
    %164 = vector.load %arg7[%c56, %c0_47] : memref<64x128xf32, #tpu.memory_space<vmem>>, vector<8x128xf32>
    %165 = arith.truncf %163 : vector<8x32xf32> to vector<8x32xbf16>
    %cst_48 = arith.constant dense<0.000000e+00> : vector<8x128xf32>
    %166 = tpu.matmul %165, %0, %cst_48 {dimension_numbers = #tpu.dot_dimension_numbers<[1], [0], [0], [1], [0, 0, 1, 1], [], []>} : vector<8x32xbf16>, vector<32x128xbf16>, vector<8x128xf32> -> vector<8x128xf32>
    %167 = arith.addf %164, %166 : vector<8x128xf32>
    %168 = arith.negf %167 : vector<8x128xf32>
    %169 = math.exp %168 : vector<8x128xf32>
    %cst_49 = arith.constant 1.000000e+00 : f32
    %170 = vector.broadcast %cst_49 : f32 to vector<8x128xf32>
    %171 = arith.addf %170, %169 : vector<8x128xf32>
    %172 = arith.divf %170, %171 : vector<8x128xf32>
    %173 = vector.extract_strided_slice %172 {offsets = [0, 0], sizes = [8, 32], strides = [1, 1]} : vector<8x128xf32> to vector<8x32xf32>
    %174 = vector.extract_strided_slice %172 {offsets = [0, 32], sizes = [8, 32], strides = [1, 1]} : vector<8x128xf32> to vector<8x32xf32>
    %175 = vector.extract_strided_slice %172 {offsets = [0, 64], sizes = [8, 32], strides = [1, 1]} : vector<8x128xf32> to vector<8x32xf32>
    %cst_50 = arith.constant 2.000000e+00 : f32
    %176 = vector.broadcast %cst_50 : f32 to vector<8x32xf32>
    %177 = arith.mulf %176, %175 : vector<8x32xf32>
    %cst_51 = arith.constant 1.000000e+00 : f32
    %178 = vector.broadcast %cst_51 : f32 to vector<8x32xf32>
    %179 = arith.subf %177, %178 : vector<8x32xf32>
    %180 = vector.extract_strided_slice %172 {offsets = [0, 96], sizes = [8, 32], strides = [1, 1]} : vector<8x128xf32> to vector<8x32xf32>
    %181 = arith.mulf %174, %161 : vector<8x32xf32>
    %182 = arith.mulf %173, %179 : vector<8x32xf32>
    %183 = arith.addf %181, %182 : vector<8x32xf32>
    %184 = math.tanh %183 : vector<8x32xf32>
    %185 = arith.mulf %180, %184 : vector<8x32xf32>
    %186 = arith.truncf %185 : vector<8x32xf32> to vector<8x32xbf16>
    %c0_52 = arith.constant 0 : index
    %c0_53 = arith.constant 0 : index
    %187 = vector.load %arg4[%c0_52, %c0_53] : memref<32x128xbf16, #tpu.memory_space<vmem>>, vector<32x128xbf16>
    %cst_54 = arith.constant dense<0.000000e+00> : vector<8x128xf32>
    %188 = tpu.matmul %186, %187, %cst_54 {dimension_numbers = #tpu.dot_dimension_numbers<[1], [0], [0], [1], [0, 0, 1, 1], [], []>} : vector<8x32xbf16>, vector<32x128xbf16>, vector<8x128xf32> -> vector<8x128xf32>
    %c0_55 = arith.constant 0 : index
    %c0_56 = arith.constant 0 : index
    %189 = vector.load %arg5[%c0_55, %c0_56] : memref<1x128xf32, #tpu.memory_space<vmem>>, vector<1x128xf32>
    %190 = vector.broadcast %189 : vector<1x128xf32> to vector<8x128xf32>
    %191 = arith.addf %188, %190 : vector<8x128xf32>
    %cst_57 = arith.constant dense<0xFF800000> : vector<8xf32>
    %192 = vector.multi_reduction <maximumf>, %191, %cst_57 [1] : vector<8x128xf32> to vector<8xf32>
    %193 = vector.shape_cast %192 : vector<8xf32> to vector<8x1xf32>
    %194 = vector.broadcast %193 : vector<8x1xf32> to vector<8x128xf32>
    %195 = arith.subf %191, %194 : vector<8x128xf32>
    %196 = math.exp %195 : vector<8x128xf32>
    %cst_58 = arith.constant dense<0.000000e+00> : vector<8xf32>
    %197 = vector.multi_reduction <add>, %196, %cst_58 [1] : vector<8x128xf32> to vector<8xf32>
    %198 = vector.shape_cast %197 : vector<8xf32> to vector<8x1xf32>
    %199 = math.log %198 : vector<8x1xf32>
    %200 = vector.broadcast %199 : vector<8x1xf32> to vector<8x128xf32>
    %201 = arith.subf %195, %200 : vector<8x128xf32>
    %c0_59 = arith.constant 0 : index
    %c0_60 = arith.constant 0 : index
    %202 = vector.load %arg6[%c0_59, %c0_60] : memref<8x128xf32, #tpu.memory_space<vmem>>, vector<8x128xf32>
    tpu.vector_store %arg6[%c0_59, %c0_60], %201 {strides = array<i32>} : memref<8x128xf32, #tpu.memory_space<vmem>>, vector<8x128xf32>,
    return
  }
}

</mosaic_0001>

<bundles_post_ra>
// kernel: tpu_custom_call.1
= control target key start
LH: loop header
LB: loop body
LE: loop exit
PB: predicated region body
PF: predicated region fallthrough
CT: control target
= control target key end

     0   :  { %vm69_vm0 = vcmask 130048   ;;  %s981_s0 = inlined_call_operand.vmem [shape: bf16[64,16], index: 0, kind: input, shape index: {}]   ;;  %s982_s1 = inlined_call_operand.vmem [shape: bf16[16,128], index: 1, kind: input, shape index: {}]   ;;  %s983_s2 = inlined_call_operand.vmem [shape: bf16[32,128], index: 2, kind: input, shape index: {}]   ;;  %s984_s3 = inlined_call_operand.vmem [shape: f32[1,128], index: 3, kind: input, shape index: {}]   ;;  %s985_s4 = inlined_call_operand.vmem [shape: bf16[32,128], index: 4, kind: input, shape index: {}]   ;;  %s986_s5 = inlined_call_operand.vmem [shape: f32[1,128], index: 5, kind: input, shape index: {}]   ;;  %s987_s6 = inlined_call_operand.hbm [shape: f32[8,128], index: 6, kind: output, shape index: {}]  }
   0x1   :  { %v745_v0 = vld [vmem:[%s982_s1] sm:$0xff]  ;;  %v877_v1 = vld [vmem:[%s983_s2 + $0x8] sm:$0xff] }
   0x2   :  { %v741_v2 = vld [vmem:[%s981_s0] sm:$0xff]  ;;  %89 = vmatpush.bf16.msra.mxu0 %v745_v0  ;;  %142 = vmatpush.bf16.msra.mxu1 %v877_v1 }
   0x3   :  { %v886_v3 = vld [vmem:[%s983_s2] sm:$0xff] }
   0x4   :  { %11 = vsyncpa [#allocation4], 0  ;;  %202 = vmatpush.bf16.msra.mxu2 %v877_v1  ;;  %262 = vmatpush.bf16.msra.mxu3 %v877_v1  ;;  %v832_v4 = vmov 0   ;;  %v905_v5 = vld [vmem:[%s984_s3] ss:$0 sm:$0xff]  ;;  %s833_s3 = smov 64  }
   0x5   :  { %695 = vmatmul.msk.bf16.vlgmr.msra.gmra.mxu0 %vm69_vm0, %v741_v2  ;;  %s834_s29 = smov 32   ;;  %vm132_vm5 = vcmask 261120   ;;  %v742_v62 = vld [vmem:[%s981_s0 + $0x8] sm:$0xff]  ;;  %s666_s20 = sshll.u32 %s987_s6, 4  ;;  %s667_s20 = int_to_ptr.hbm [resolvable:$true] %s666_s20 }
   0x6   :  { %143 = vmatpush.bf16.msra.mxu1 %v886_v3 }
   0x8   :  { %203 = vmatpush.bf16.msra.mxu2 %v886_v3  ;;  %263 = vmatpush.bf16.msra.mxu3 %v886_v3 }
   0x9   :  { %144 = vmatmul.bf16.vlgmr.msra.gmra.mxu1 %v832_v4 }
   0xa   :  { %322 = vmatpush.bf16.msrb.mxu1 %v877_v1 }
   0xc   :  { %382 = vmatpush.bf16.msrb.mxu2 %v877_v1  ;;  %442 = vmatpush.bf16.msrb.mxu3 %v877_v1 }
   0xe   :  { %323 = vmatpush.bf16.msrb.mxu1 %v886_v3 }
  0x10   :  { %383 = vmatpush.bf16.msrb.mxu2 %v886_v3  ;;  %443 = vmatpush.bf16.msrb.mxu3 %v886_v3 }
  0x12   :  { %502 = vmatpush.bf16.msra.mxu1 %v877_v1 }
  0x15   :  { %696 = vmatmul.msk.bf16.gmra.mxu0 %vm69_vm0, %v742_v62 }
  0x16   :  { %503 = vmatpush.bf16.msra.mxu1 %v886_v3 }
  0x82   :  { %v91_v6 = vpop.f32.mrf.mxu0 }
  0x83   :  { %v92_v7 = vadd.f32 %v905_v5, %v91_v6 }
  0x86   :  { %v145_v8 = vpop.f32.mrf.mxu1 }
  0x87   :  { %v149_v9 = vadd.f32 %v145_v8, %v92_v7 }
  0x89   :  { %v707_v10 = vmul.f32 -1.442695, %v149_v9 }
  0x8a   :  { %v93_v36 = vpop.f32.mrf.mxu0 }
  0x8b   :  { %754 = vpow2.f32 %v707_v10  ;;  %v94_v37 = vadd.f32 %v905_v5, %v93_v36 }
  0x8e   :  { %v147_v11 = vpop.f32.mrf.mxu1 }
  0x91   :  { %v755_v12 = vpop.eup %754 }
  0x92   :  { %v153_v13 = vadd.f32 1.0, %v755_v12 }
  0x94   :  { %756 = vrcp.f32 %v153_v13  ;;  %v165_v17 = vand.u32 2147483648, %v153_v13  ;;  %v163_v19 = vand.u32 2147483647, %v153_v13  ;;  %vm159_vm2 = vweird.f32 %v153_v13 }
  0x96   :  { %v166_v21 = vor.u32 1.1754944e-38, %v165_v17  ;;  %vm164_vm4 = vcmp.eq.f32.partialorder %v163_v19, 8.507059e+37 }
  0x9a   :  { %v757_v14 = vpop.eup %756 }
  0x9b   :  { %v155_v15 = vmul.f32 %v757_v14, %v153_v13  ;;  %vm160_vm1 = vweird.f32 %v757_v14 }
  0x9c   :  { %vm161_vm3 = vmor %vm159_vm2, %vm160_vm1 }
  0x9d   :  { %v156_v16 = vsub.f32 1.0, %v155_v15 }
  0x9f   :  { %v157_v18 = vmul.f32 %v757_v14, %v156_v16 }
  0xa1   :  { %v158_v20 = vadd.f32 %v757_v14, %v157_v18 }
  0xa3   :  { %v162_v22 = vsel %vm161_vm3, %v757_v14, %v158_v20 }
  0xa4   :  { %v167_v23 = vsel %vm164_vm4, %v166_v21, %v162_v22 }
  0xa5   :  { %v169_v24 = vmul.f32 2.0, %v167_v23  ;;  %v171_v28 = vmul.f32 0.0, %v167_v23 }
  0xa7   :  { %v708_v25 = vadd.f32 -1.0, %v169_v24 }
  0xa9   :  { %173 = vrot.lane.b32.xlu0 %v708_v25, %s833_s3 }
 0x11b   :  { %v174_v26 = vpop.permute.xlu0 %173 }
 0x11c   :  { %v176_v27 = vmul.f32 %v174_v26, %v167_v23 }
 0x11e   :  { %178 = vrot.lane.b32.xlu0 %v176_v27, %s834_s29 }
 0x190   :  { %v179_v29 = vpop.permute.xlu0 %178 }
 0x191   :  { %v181_v30 = vadd.f32 %v179_v29, %v171_v28 }
 0x193   :  { %758 = vtanh.f32 %v181_v30 }
 0x199   :  { %v759_v31 = vpop.eup %758 }
 0x19a   :  { %184 = vrot.lane.b32.xlu1 %v759_v31, %s833_s3 }
 0x20c   :  { %v185_v32 = vpop.permute.xlu1 %184 }
 0x20d   :  { %v187_v33 = vmul.f32 %v185_v32, %v167_v23 }
 0x20f   :  { %v189_v34 = vpack.c.bf16 %v187_v33, %v187_v33 }
 0x211   :  { %191 = vrot.lane.b32.xlu1 %v189_v34, %s834_s29 }
 0x283   :  { %v192_v35 = vpop.permute.xlu1 %191 }
 0x284   :  { %709 = vmatmul.msk.bf16.vlgmr.msra.gmra.mxu2 %vm132_vm5, %v192_v35 }
 0x285   :  { %562 = vmatpush.bf16.msra.mxu2 %v877_v1 }
 0x289   :  { %563 = vmatpush.bf16.msra.mxu2 %v886_v3  ;;  %v96_v3 = vpop.f32.mrf.mxu0 }
 0x28a   :  { %v97_v4 = vadd.f32 %v905_v5, %v96_v3 }
 0x291   :  { %v98_v34 = vpop.f32.mrf.mxu0 }
 0x292   :  { %v99_v35 = vadd.f32 %v905_v5, %v98_v34 }
 0x307   :  { %v205_v38 = vpop.f32.mrf.mxu2 }
 0x308   :  { %v209_v39 = vadd.f32 %v205_v38, %v94_v37 }
 0x30a   :  { %v710_v40 = vmul.f32 -1.442695, %v209_v39 }
 0x30c   :  { %760 = vpow2.f32 %v710_v40 }
 0x30f   :  { %v207_v41 = vpop.f32.mrf.mxu2 }
 0x312   :  { %v761_v42 = vpop.eup %760 }
 0x313   :  { %v213_v43 = vadd.f32 1.0, %v761_v42 }
 0x315   :  { %762 = vrcp.f32 %v213_v43  ;;  %v225_v47 = vand.u32 2147483648, %v213_v43  ;;  %v223_v49 = vand.u32 2147483647, %v213_v43  ;;  %vm219_vm7 = vweird.f32 %v213_v43 }
 0x317   :  { %v226_v51 = vor.u32 1.1754944e-38, %v225_v47  ;;  %vm224_vm9 = vcmp.eq.f32.partialorder %v223_v49, 8.507059e+37 }
 0x31b   :  { %v763_v44 = vpop.eup %762 }
 0x31c   :  { %v215_v45 = vmul.f32 %v763_v44, %v213_v43  ;;  %vm220_vm6 = vweird.f32 %v763_v44 }
 0x31d   :  { %vm221_vm8 = vmor %vm219_vm7, %vm220_vm6 }
 0x31e   :  { %v216_v46 = vsub.f32 1.0, %v215_v45 }
 0x320   :  { %v217_v48 = vmul.f32 %v763_v44, %v216_v46 }
 0x322   :  { %v218_v50 = vadd.f32 %v763_v44, %v217_v48 }
 0x324   :  { %v222_v52 = vsel %vm221_vm8, %v763_v44, %v218_v50 }
 0x325   :  { %v227_v53 = vsel %vm224_vm9, %v226_v51, %v222_v52 }
 0x326   :  { %v229_v54 = vmul.f32 2.0, %v227_v53  ;;  %v231_v58 = vmul.f32 %v227_v53, %v181_v30 }
 0x328   :  { %v711_v55 = vadd.f32 -1.0, %v229_v54 }
 0x32a   :  { %233 = vrot.lane.b32.xlu2 %v711_v55, %s833_s3 }
 0x384   :  { %v234_v56 = vpop.permute.xlu2 %233 }
 0x385   :  { %v236_v57 = vmul.f32 %v234_v56, %v227_v53 }
 0x387   :  { %238 = vrot.lane.b32.xlu2 %v236_v57, %s834_s29 }
 0x3e1   :  { %v239_v59 = vpop.permute.xlu2 %238 }
 0x3e2   :  { %v241_v60 = vadd.f32 %v239_v59, %v231_v58 }
 0x3e4   :  { %764 = vtanh.f32 %v241_v60 }
 0x3ea   :  { %v765_v61 = vpop.eup %764 }
 0x3eb   :  { %244 = vrot.lane.b32.xlu0 %v765_v61, %s833_s3 }
 0x45d   :  { %v245_v63 = vpop.permute.xlu0 %244 }
 0x45e   :  { %v247_v0 = vmul.f32 %v245_v63, %v227_v53 }
 0x460   :  { %v249_v1 = vpack.c.bf16 %v247_v0, %v247_v0 }
 0x462   :  { %251 = vrot.lane.b32.xlu1 %v249_v1, %s834_s29 }
 0x4d4   :  { %v252_v2 = vpop.permute.xlu1 %251 }
 0x4d5   :  { %712 = vmatmul.msk.bf16.vlgmr.msra.gmra.mxu3 %vm132_vm5, %v252_v2 }
 0x558   :  { %v265_v6 = vpop.f32.mrf.mxu3 }
 0x559   :  { %v269_v7 = vadd.f32 %v265_v6, %v97_v4 }
 0x55b   :  { %v713_v8 = vmul.f32 -1.442695, %v269_v7 }
 0x55d   :  { %766 = vpow2.f32 %v713_v8 }
 0x560   :  { %v267_v9 = vpop.f32.mrf.mxu3 }
 0x563   :  { %v767_v10 = vpop.eup %766 }
 0x564   :  { %v273_v11 = vadd.f32 1.0, %v767_v10 }
 0x566   :  { %768 = vrcp.f32 %v273_v11  ;;  %v285_v15 = vand.u32 2147483648, %v273_v11  ;;  %v283_v17 = vand.u32 2147483647, %v273_v11  ;;  %vm279_vm11 = vweird.f32 %v273_v11 }
 0x568   :  { %v286_v19 = vor.u32 1.1754944e-38, %v285_v15  ;;  %vm284_vm13 = vcmp.eq.f32.partialorder %v283_v17, 8.507059e+37 }
 0x56c   :  { %v769_v12 = vpop.eup %768 }
 0x56d   :  { %v275_v13 = vmul.f32 %v769_v12, %v273_v11  ;;  %vm280_vm10 = vweird.f32 %v769_v12 }
 0x56e   :  { %vm281_vm12 = vmor %vm279_vm11, %vm280_vm10 }
 0x56f   :  { %v276_v14 = vsub.f32 1.0, %v275_v13 }
 0x571   :  { %v277_v16 = vmul.f32 %v769_v12, %v276_v14 }
 0x573   :  { %v278_v18 = vadd.f32 %v769_v12, %v277_v16 }
 0x575   :  { %v282_v20 = vsel %vm281_vm12, %v769_v12, %v278_v18 }
 0x576   :  { %v287_v21 = vsel %vm284_vm13, %v286_v19, %v282_v20 }
 0x577   :  { %v289_v22 = vmul.f32 2.0, %v287_v21  ;;  %v291_v26 = vmul.f32 %v287_v21, %v241_v60  ;;  %v743_v60 = vld [vmem:[%s981_s0 + $0x10] sm:$0xff] }
 0x578   :  { %697 = vmatmul.msk.bf16.gmra.mxu0 %vm69_vm0, %v743_v60 }
 0x579   :  { %v714_v23 = vadd.f32 -1.0, %v289_v22 }
 0x57b   :  { %293 = vrot.lane.b32.xlu2 %v714_v23, %s833_s3 }
 0x5d5   :  { %v294_v24 = vpop.permute.xlu2 %293 }
 0x5d6   :  { %v296_v25 = vmul.f32 %v294_v24, %v287_v21 }
 0x5d8   :  { %298 = vrot.lane.b32.xlu0 %v296_v25, %s834_s29 }
 0x5f5   :  { %v101_v1 = vpop.f32.mrf.mxu0 }
 0x5f6   :  { %v102_v2 = vadd.f32 %v905_v5, %v101_v1 }
 0x64a   :  { %v299_v27 = vpop.permute.xlu0 %298 }
 0x64b   :  { %v301_v28 = vadd.f32 %v299_v27, %v291_v26 }
 0x64d   :  { %770 = vtanh.f32 %v301_v28 }
 0x653   :  { %v771_v29 = vpop.eup %770 }
 0x654   :  { %304 = vrot.lane.b32.xlu1 %v771_v29, %s833_s3 }
 0x6c6   :  { %v305_v30 = vpop.permute.xlu1 %304 }
 0x6c7   :  { %v307_v31 = vmul.f32 %v305_v30, %v287_v21 }
 0x6c9   :  { %v309_v32 = vpack.c.bf16 %v307_v31, %v307_v31 }
 0x6cb   :  { %311 = vrot.lane.b32.xlu2 %v309_v32, %s834_s29  ;;  %v103_v32 = vpop.f32.mrf.mxu0 }
 0x725   :  { %v312_v33 = vpop.permute.xlu2 %311 }
 0x726   :  { %715 = vmatmul.msk.bf16.vlgmr.msrb.gmra.mxu1 %vm132_vm5, %v312_v33  ;;  %v104_v33 = vadd.f32 %v905_v5, %v103_v32 }
 0x7a3   :  { %v325_v36 = vpop.f32.mrf.mxu1 }
 0x7a4   :  { %v329_v37 = vadd.f32 %v325_v36, %v99_v35 }
 0x7a6   :  { %v716_v38 = vmul.f32 -1.442695, %v329_v37 }
 0x7a8   :  { %772 = vpow2.f32 %v716_v38 }
 0x7ab   :  { %v327_v39 = vpop.f32.mrf.mxu1 }
 0x7ae   :  { %v773_v40 = vpop.eup %772 }
 0x7af   :  { %v333_v41 = vadd.f32 1.0, %v773_v40 }
 0x7b1   :  { %774 = vrcp.f32 %v333_v41  ;;  %v345_v45 = vand.u32 2147483648, %v333_v41  ;;  %v343_v47 = vand.u32 2147483647, %v333_v41  ;;  %vm339_vm15 = vweird.f32 %v333_v41 }
 0x7b3   :  { %v346_v49 = vor.u32 1.1754944e-38, %v345_v45  ;;  %vm344_vm2 = vcmp.eq.f32.partialorder %v343_v47, 8.507059e+37 }
 0x7b7   :  { %v775_v42 = vpop.eup %774 }
 0x7b8   :  { %v335_v43 = vmul.f32 %v775_v42, %v333_v41  ;;  %vm340_vm14 = vweird.f32 %v775_v42 }
 0x7b9   :  { %vm341_vm1 = vmor %vm339_vm15, %vm340_vm14 }
 0x7ba   :  { %v336_v44 = vsub.f32 1.0, %v335_v43 }
 0x7bc   :  { %v337_v46 = vmul.f32 %v775_v42, %v336_v44 }
 0x7be   :  { %v338_v48 = vadd.f32 %v775_v42, %v337_v46 }
 0x7c0   :  { %v342_v50 = vsel %vm341_vm1, %v775_v42, %v338_v48 }
 0x7c1   :  { %v347_v51 = vsel %vm344_vm2, %v346_v49, %v342_v50 }
 0x7c2   :  { %v349_v52 = vmul.f32 2.0, %v347_v51  ;;  %v351_v56 = vmul.f32 %v347_v51, %v301_v28 }
 0x7c4   :  { %v717_v53 = vadd.f32 -1.0, %v349_v52 }
 0x7c6   :  { %353 = vrot.lane.b32.xlu0 %v717_v53, %s833_s3 }
 0x838   :  { %v354_v54 = vpop.permute.xlu0 %353 }
 0x839   :  { %v356_v55 = vmul.f32 %v354_v54, %v347_v51 }
 0x83b   :  { %358 = vrot.lane.b32.xlu1 %v356_v55, %s834_s29 }
 0x8ad   :  { %v359_v57 = vpop.permute.xlu1 %358 }
 0x8ae   :  { %v361_v58 = vadd.f32 %v359_v57, %v351_v56 }
 0x8b0   :  { %776 = vtanh.f32 %v361_v58 }
 0x8b6   :  { %v777_v59 = vpop.eup %776 }
 0x8b7   :  { %364 = vrot.lane.b32.xlu2 %v777_v59, %s833_s3 }
 0x911   :  { %v365_v61 = vpop.permute.xlu2 %364 }
 0x912   :  { %v367_v62 = vmul.f32 %v365_v61, %v347_v51 }
 0x914   :  { %v369_v63 = vpack.c.bf16 %v367_v62, %v367_v62 }
 0x916   :  { %371 = vrot.lane.b32.xlu0 %v369_v63, %s834_s29 }
 0x988   :  { %v372_v0 = vpop.permute.xlu0 %371 }
 0x989   :  { %718 = vmatmul.msk.bf16.vlgmr.msrb.gmra.mxu2 %vm132_vm5, %v372_v0 }
 0xa0c   :  { %v385_v3 = vpop.f32.mrf.mxu2 }
 0xa0d   :  { %v389_v4 = vadd.f32 %v385_v3, %v102_v2 }
 0xa0f   :  { %v719_v6 = vmul.f32 -1.442695, %v389_v4 }
 0xa11   :  { %778 = vpow2.f32 %v719_v6 }
 0xa14   :  { %v387_v7 = vpop.f32.mrf.mxu2 }
 0xa17   :  { %v779_v8 = vpop.eup %778 }
 0xa18   :  { %v393_v9 = vadd.f32 1.0, %v779_v8 }
 0xa1a   :  { %780 = vrcp.f32 %v393_v9  ;;  %v405_v13 = vand.u32 2147483648, %v393_v9  ;;  %v403_v15 = vand.u32 2147483647, %v393_v9  ;;  %vm399_vm4 = vweird.f32 %v393_v9 }
 0xa1c   :  { %v406_v17 = vor.u32 1.1754944e-38, %v405_v13  ;;  %vm404_vm7 = vcmp.eq.f32.partialorder %v403_v15, 8.507059e+37 }
 0xa20   :  { %v781_v10 = vpop.eup %780 }
 0xa21   :  { %v395_v11 = vmul.f32 %v781_v10, %v393_v9  ;;  %vm400_vm3 = vweird.f32 %v781_v10 }
 0xa22   :  { %vm401_vm6 = vmor %vm399_vm4, %vm400_vm3 }
 0xa23   :  { %v396_v12 = vsub.f32 1.0, %v395_v11 }
 0xa25   :  { %v397_v14 = vmul.f32 %v781_v10, %v396_v12 }
 0xa27   :  { %v398_v16 = vadd.f32 %v781_v10, %v397_v14 }
 0xa29   :  { %v402_v18 = vsel %vm401_vm6, %v781_v10, %v398_v16 }
 0xa2a   :  { %v407_v19 = vsel %vm404_vm7, %v406_v17, %v402_v18 }
 0xa2b   :  { %v409_v20 = vmul.f32 2.0, %v407_v19  ;;  %v411_v24 = vmul.f32 %v407_v19, %v361_v58  ;;  %v744_v58 = vld [vmem:[%s981_s0 + $0x18] sm:$0xff] }
 0xa2c   :  { %698 = vmatmul.msk.bf16.gmra.mxu0 %vm69_vm0, %v744_v58 }
 0xa2d   :  { %v720_v21 = vadd.f32 -1.0, %v409_v20 }
 0xa2f   :  { %413 = vrot.lane.b32.xlu1 %v720_v21, %s833_s3 }
 0xaa1   :  { %v414_v22 = vpop.permute.xlu1 %413 }
 0xaa2   :  { %v416_v23 = vmul.f32 %v414_v22, %v407_v19 }
 0xaa4   :  { %418 = vrot.lane.b32.xlu2 %v416_v23, %s834_s29 }
 0xaa9   :  { %v106_v63 = vpop.f32.mrf.mxu0 }
 0xaaa   :  { %v107_v0 = vadd.f32 %v905_v5, %v106_v63 }
 0xafe   :  { %v419_v25 = vpop.permute.xlu2 %418 }
 0xaff   :  { %v421_v26 = vadd.f32 %v419_v25, %v411_v24 }
 0xb01   :  { %782 = vtanh.f32 %v421_v26 }
 0xb07   :  { %v783_v27 = vpop.eup %782 }
 0xb08   :  { %424 = vrot.lane.b32.xlu0 %v783_v27, %s833_s3 }
 0xb7a   :  { %v425_v28 = vpop.permute.xlu0 %424 }
 0xb7b   :  { %v427_v29 = vmul.f32 %v425_v28, %v407_v19 }
 0xb7d   :  { %v429_v30 = vpack.c.bf16 %v427_v29, %v427_v29 }
 0xb7f   :  { %431 = vrot.lane.b32.xlu1 %v429_v30, %s834_s29  ;;  %v108_v30 = vpop.f32.mrf.mxu0 }
 0xbf1   :  { %v432_v31 = vpop.permute.xlu1 %431 }
 0xbf2   :  { %721 = vmatmul.msk.bf16.vlgmr.msrb.gmra.mxu3 %vm132_vm5, %v432_v31  ;;  %v109_v31 = vadd.f32 %v905_v5, %v108_v30 }
 0xc75   :  { %v445_v34 = vpop.f32.mrf.mxu3 }
 0xc76   :  { %v449_v35 = vadd.f32 %v445_v34, %v104_v33 }
 0xc78   :  { %v722_v36 = vmul.f32 -1.442695, %v449_v35 }
 0xc7a   :  { %784 = vpow2.f32 %v722_v36 }
 0xc7d   :  { %v447_v37 = vpop.f32.mrf.mxu3 }
 0xc80   :  { %v785_v38 = vpop.eup %784 }
 0xc81   :  { %v453_v39 = vadd.f32 1.0, %v785_v38 }
 0xc83   :  { %786 = vrcp.f32 %v453_v39  ;;  %v465_v43 = vand.u32 2147483648, %v453_v39  ;;  %v463_v45 = vand.u32 2147483647, %v453_v39  ;;  %vm459_vm9 = vweird.f32 %v453_v39 }
 0xc85   :  { %v466_v47 = vor.u32 1.1754944e-38, %v465_v43  ;;  %vm464_vm11 = vcmp.eq.f32.partialorder %v463_v45, 8.507059e+37 }
 0xc89   :  { %v787_v40 = vpop.eup %786 }
 0xc8a   :  { %v455_v41 = vmul.f32 %v787_v40, %v453_v39  ;;  %vm460_vm8 = vweird.f32 %v787_v40 }
 0xc8b   :  { %vm461_vm10 = vmor %vm459_vm9, %vm460_vm8 }
 0xc8c   :  { %v456_v42 = vsub.f32 1.0, %v455_v41 }
 0xc8e   :  { %v457_v44 = vmul.f32 %v787_v40, %v456_v42 }
 0xc90   :  { %v458_v46 = vadd.f32 %v787_v40, %v457_v44 }
 0xc92   :  { %v462_v48 = vsel %vm461_vm10, %v787_v40, %v458_v46 }
 0xc93   :  { %v467_v49 = vsel %vm464_vm11, %v466_v47, %v462_v48 }
 0xc94   :  { %v469_v50 = vmul.f32 2.0, %v467_v49  ;;  %v471_v54 = vmul.f32 %v467_v49, %v421_v26 }
 0xc96   :  { %v723_v51 = vadd.f32 -1.0, %v469_v50 }
 0xc98   :  { %473 = vrot.lane.b32.xlu2 %v723_v51, %s833_s3 }
 0xcf2   :  { %v474_v52 = vpop.permute.xlu2 %473 }
 0xcf3   :  { %v476_v53 = vmul.f32 %v474_v52, %v467_v49 }
 0xcf5   :  { %478 = vrot.lane.b32.xlu0 %v476_v53, %s834_s29 }
 0xd67   :  { %v479_v55 = vpop.permute.xlu0 %478 }
 0xd68   :  { %v481_v56 = vadd.f32 %v479_v55, %v471_v54  ;;  %v747_v55 = vld [vmem:[%s985_s4 + $0x8] sm:$0xff] }
 0xd69   :  { %641 = vmatpush.bf16.msra.mxu3 %v747_v55 }
 0xd6a   :  { %788 = vtanh.f32 %v481_v56 }
 0xd70   :  { %v789_v57 = vpop.eup %788 }
 0xd71   :  { %484 = vrot.lane.b32.xlu1 %v789_v57, %s833_s3 }
 0xde3   :  { %v485_v59 = vpop.permute.xlu1 %484 }
 0xde4   :  { %v487_v60 = vmul.f32 %v485_v59, %v467_v49 }
 0xde6   :  { %v489_v61 = vpack.c.bf16 %v487_v60, %v487_v60 }
 0xde8   :  { %491 = vrot.lane.b32.xlu2 %v489_v61, %s834_s29  ;;  %v753_v61 = vld [vmem:[%s986_s5] ss:$0 sm:$0xff] }
 0xe42   :  { %v492_v62 = vpop.permute.xlu2 %491 }
 0xe43   :  { %724 = vmatmul.msk.bf16.vlgmr.msra.gmra.mxu1 %vm132_vm5, %v492_v62 }
 0xec0   :  { %v505_v1 = vpop.f32.mrf.mxu1 }
 0xec1   :  { %v509_v2 = vadd.f32 %v505_v1, %v107_v0 }
 0xec3   :  { %v725_v3 = vmul.f32 -1.442695, %v509_v2 }
 0xec5   :  { %790 = vpow2.f32 %v725_v3 }
 0xec8   :  { %v507_v4 = vpop.f32.mrf.mxu1 }
 0xecb   :  { %v791_v6 = vpop.eup %790 }
 0xecc   :  { %v513_v7 = vadd.f32 1.0, %v791_v6 }
 0xece   :  { %792 = vrcp.f32 %v513_v7  ;;  %v525_v11 = vand.u32 2147483648, %v513_v7  ;;  %v523_v13 = vand.u32 2147483647, %v513_v7  ;;  %vm519_vm12 = vweird.f32 %v513_v7 }
 0xed0   :  { %v526_v15 = vor.u32 1.1754944e-38, %v525_v11  ;;  %vm524_vm14 = vcmp.eq.f32.partialorder %v523_v13, 8.507059e+37 }
 0xed4   :  { %v793_v8 = vpop.eup %792 }
 0xed5   :  { %v515_v9 = vmul.f32 %v793_v8, %v513_v7  ;;  %vm520_vm0 = vweird.f32 %v793_v8 }
 0xed6   :  { %vm521_vm13 = vmor %vm519_vm12, %vm520_vm0 }
 0xed7   :  { %v516_v10 = vsub.f32 1.0, %v515_v9 }
 0xed9   :  { %v517_v12 = vmul.f32 %v793_v8, %v516_v10 }
 0xedb   :  { %v518_v14 = vadd.f32 %v793_v8, %v517_v12 }
 0xedd   :  { %v522_v16 = vsel %vm521_vm13, %v793_v8, %v518_v14 }
 0xede   :  { %v527_v17 = vsel %vm524_vm14, %v526_v15, %v522_v16 }
 0xedf   :  { %v529_v18 = vmul.f32 2.0, %v527_v17  ;;  %v531_v22 = vmul.f32 %v527_v17, %v481_v56  ;;  %v746_v56 = vld [vmem:[%s985_s4] sm:$0xff]  ;;  %s835_s4 = smov [#allocation3]  }
 0xee0   :  { %642 = vmatpush.bf16.msra.mxu3 %v746_v56  ;;  %s664_s17 = sshll.u32 %s835_s4, 4  ;;  %s665_s17 = int_to_ptr.vmem [resolvable:$true] %s664_s17 }
 0xee1   :  { %v726_v19 = vadd.f32 -1.0, %v529_v18 }
 0xee3   :  { %533 = vrot.lane.b32.xlu0 %v726_v19, %s833_s3 }
 0xf55   :  { %v534_v20 = vpop.permute.xlu0 %533 }
 0xf56   :  { %v536_v21 = vmul.f32 %v534_v20, %v527_v17 }
 0xf58   :  { %538 = vrot.lane.b32.xlu1 %v536_v21, %s834_s29 }
 0xfca   :  { %v539_v23 = vpop.permute.xlu1 %538 }
 0xfcb   :  { %v541_v24 = vadd.f32 %v539_v23, %v531_v22 }
 0xfcd   :  { %794 = vtanh.f32 %v541_v24 }
 0xfd3   :  { %v795_v25 = vpop.eup %794 }
 0xfd4   :  { %544 = vrot.lane.b32.xlu2 %v795_v25, %s833_s3 }
0x102e   :  { %v545_v26 = vpop.permute.xlu2 %544 }
0x102f   :  { %v547_v27 = vmul.f32 %v545_v26, %v527_v17 }
0x1031   :  { %v549_v28 = vpack.c.bf16 %v547_v27, %v547_v27 }
0x1033   :  { %551 = vrot.lane.b32.xlu0 %v549_v28, %s834_s29 }
0x10a5   :  { %v552_v29 = vpop.permute.xlu0 %551 }
0x10a6   :  { %727 = vmatmul.msk.bf16.vlgmr.msra.gmra.mxu2 %vm132_vm5, %v552_v29 }
0x1129   :  { %v565_v32 = vpop.f32.mrf.mxu2 }
0x112a   :  { %v569_v33 = vadd.f32 %v565_v32, %v109_v31 }
0x112c   :  { %v728_v34 = vmul.f32 -1.442695, %v569_v33 }
0x112e   :  { %796 = vpow2.f32 %v728_v34 }
0x1131   :  { %v567_v35 = vpop.f32.mrf.mxu2 }
0x1134   :  { %v797_v36 = vpop.eup %796 }
0x1135   :  { %v573_v37 = vadd.f32 1.0, %v797_v36 }
0x1137   :  { %798 = vrcp.f32 %v573_v37  ;;  %v585_v41 = vand.u32 2147483648, %v573_v37  ;;  %v583_v43 = vand.u32 2147483647, %v573_v37  ;;  %vm579_vm1 = vweird.f32 %v573_v37 }
0x1139   :  { %v586_v45 = vor.u32 1.1754944e-38, %v585_v41  ;;  %vm584_vm3 = vcmp.eq.f32.partialorder %v583_v43, 8.507059e+37 }
0x113d   :  { %v799_v38 = vpop.eup %798 }
0x113e   :  { %v575_v39 = vmul.f32 %v799_v38, %v573_v37  ;;  %vm580_vm15 = vweird.f32 %v799_v38 }
0x113f   :  { %vm581_vm2 = vmor %vm579_vm1, %vm580_vm15 }
0x1140   :  { %v576_v40 = vsub.f32 1.0, %v575_v39 }
0x1142   :  { %v577_v42 = vmul.f32 %v799_v38, %v576_v40 }
0x1144   :  { %v578_v44 = vadd.f32 %v799_v38, %v577_v42 }
0x1146   :  { %v582_v5 = vsel %vm581_vm2, %v799_v38, %v578_v44 }
0x1147   :  { %v587_v46 = vsel %vm584_vm3, %v586_v45, %v582_v5 }
0x1148   :  { %v589_v47 = vmul.f32 2.0, %v587_v46  ;;  %v591_v51 = vmul.f32 %v587_v46, %v541_v24 }
0x114a   :  { %v729_v48 = vadd.f32 -1.0, %v589_v47 }
0x114c   :  { %593 = vrot.lane.b32.xlu1 %v729_v48, %s833_s3 }
0x11be   :  { %v594_v49 = vpop.permute.xlu1 %593 }
0x11bf   :  { %v596_v50 = vmul.f32 %v594_v49, %v587_v46 }
0x11c1   :  { %598 = vrot.lane.b32.xlu2 %v596_v50, %s834_s29 }
0x121b   :  { %v599_v52 = vpop.permute.xlu2 %598 }
0x121c   :  { %v601_v53 = vadd.f32 %v599_v52, %v591_v51 }
0x121e   :  { %800 = vtanh.f32 %v601_v53 }
0x1224   :  { %v801_v54 = vpop.eup %800 }
0x1225   :  { %604 = vrot.lane.b32.xlu0 %v801_v54, %s833_s3 }
0x1297   :  { %v605_v57 = vpop.permute.xlu0 %604 }
0x1298   :  { %v607_v58 = vmul.f32 %v605_v57, %v587_v46 }
0x129a   :  { %v608_v59 = vpack.c.bf16 %v607_v58, %v607_v58 }
0x129c   :  { %618 = vrot.lane.b32.xlu1 %v608_v59, %s834_s29 }
0x130e   :  { %v619_v60 = vpop.permute.xlu1 %618 }
0x130f   :  { %738 = vmatmul.msk.bf16.vlgmr.msra.gmra.mxu3 %vm132_vm5, %v619_v60 }
0x1392   :  { %v644_v62 = vpop.f32.mrf.mxu3 }
0x1393   :  { %v645_v63 = vadd.f32 %v753_v61, %v644_v62 }
0x1395   :  { %648 = vmax.xlane.f32.xlu2 %v645_v63 }
0x139a   :  { %v646_v0 = vpop.f32.mrf.mxu3 }
0x1408   :  { %v649_v1 = vpop.xlane.xlu2 %648 }
0x1409   :  { %v650_v2 = vsub.f32 %v645_v63, %v649_v1 }
0x140b   :  { %v651_v3 = vmul.f32 1.442695, %v650_v2 }
0x140d   :  { %802 = vpow2.f32 %v651_v3 }
0x1413   :  { %v803_v4 = vpop.eup %802 }
0x1414   :  { %653 = vadd.xlane.f32.xlu0 %v803_v4 }
0x1487   :  { %v654_v6 = vpop.xlane.xlu0 %653 }
0x1488   :  { %804 = vlog2.f32 %v654_v6 }
0x148e   :  { %v805_v7 = vpop.eup %804 }
0x148f   :  { %v656_v8 = vmul.f32 0.6931472, %v805_v7 }
0x1491   :  { %v657_v9 = vsub.f32 %v650_v2, %v656_v8 }
0x1493   :  { %658 = vst [vmem:[#allocation3] sm:$0xff] %v657_v9 }
0x1494   :  { %669 = dma.vmem_to_hbm [thread:$0]  %s665_s17, 128, %s667_s20, [#allocation4]  }
0x1495   :  { %830 = dma.done.wait [#allocation4], 128  }
0x1496   :  { %831 = vsyncadd [#allocation4], 4294967168 }
0x1497   :  { %674 = vsyncpa [#allocation4], 1 }

</bundles_post_ra>
